<compile_context>
chip_gen: v7x
topology: tpu7x:2x2x1
jax: 0.10.0
libtpu: 0.0.40
codegen_flags: <defaults>
</compile_context>

<pallas_src>
import functools

import jax
import jax.numpy as jnp
from jax.experimental import pallas as pl
from jax.experimental.pallas import tpu as pltpu

_NBINS_HI = 32          # "hi" one-hot rows (sublanes)
_NBINS_LO = 32          # "lo" one-hot rows (sublanes)
_NBINS_LO_BITS = 5      # log2(_NBINS_LO)
_NBINS = _NBINS_HI * _NBINS_LO   # 1024 prob-histogram bins over [0, 1]


def _ohem_ce_kernel(score_ref, target_ref, stats_ref, hist_ref, *,
                    ignore_label: int, use_bf16_exp: bool):
    """Per-pixel CE loss + target-class prob + partial prob histogram.

    score_ref : [C, TP]  logits (classes on sublanes, pixels on lanes)
    target_ref: [1, TP]  int32 labels (may contain ignore_label)
    stats_ref : [2, TP]  f32   row 0 = CE loss (0 for ignored pixels)
                               row 1 = softmax prob of target class (+inf if ignored)
    hist_ref  : [32, 32] f32   hist[h, l] = #valid pixels with prob-bin h*32 + l
    """
    x = score_ref[...].astype(jnp.float32)                 # [C, TP]
    t = target_ref[...]                                    # [1, TP] int32

    # log-sum-exp over classes (sublane axis).
    m = jnp.max(x, axis=0, keepdims=True)                  # [1, TP]
    xm = x - m                                             # [C, TP]
    if use_bf16_exp:
        # v6e/v7x: EUP has a native bf16 path (~2x exp throughput); accumulate in f32.
        ex = jnp.exp(xm.astype(jnp.bfloat16)).astype(jnp.float32)
    else:
        ex = jnp.exp(xm)                                   # [C, TP]
    log_se = jnp.log(jnp.sum(ex, axis=0, keepdims=True))   # [1, TP]

    valid = t != ignore_label                              # [1, TP] bool

    # Exact clamp semantics of the reference:
    #   tmp_target[tmp_target >= ignore_label] = 0 ; tmp_target[tmp_target < 0] = 0
    tc = jnp.where(t >= ignore_label, 0, t)
    tc = jnp.where(tc < 0, 0, tc)                          # [1, TP]
    # NOTE: labels in [C, ignore_label) yield an all-false one-hot (bogus loss),
    # exactly as hazardous as in the PyTorch reference; no extra guard added.

    # Gather (x - m) at the target class via a broadcast one-hot ([C,1] iota).
    cls_iota = jax.lax.broadcasted_iota(jnp.int32, (x.shape[0], 1), 0)   # [C, 1]
    onehot = cls_iota == tc                                              # [C, TP]
    xm_t = jnp.sum(jnp.where(onehot, xm, 0.0), axis=0, keepdims=True)    # [1, TP]

    logp_t = xm_t - log_se                                 # log-softmax at target
    loss = jnp.where(valid, -logp_t, 0.0)                  # CE, 0 where ignored
    p = jnp.exp(logp_t)                                    # target-class prob (finite)

    stats_ref[0:1, :] = loss
    stats_ref[1:2, :] = jnp.where(valid, p, jnp.inf)       # +inf sentinel if ignored

    # ---- 1024-bin histogram of p over valid pixels (replaces the top_k glue) ----
    idx = jnp.clip((p * float(_NBINS)).astype(jnp.int32), 0, _NBINS - 1)
    idx = jnp.where(valid, idx, _NBINS)                    # invalid -> out-of-range bin
    hi = idx >> _NBINS_LO_BITS                             # [1, TP]; == 32 for invalid
    lo = idx & (_NBINS_LO - 1)                             # [1, TP]
    hi_iota = jax.lax.broadcasted_iota(jnp.int32, (_NBINS_HI, 1), 0)
    lo_iota = jax.lax.broadcasted_iota(jnp.int32, (_NBINS_LO, 1), 0)
    oh_hi = (hi_iota == hi).astype(jnp.float32)            # [32, TP]
    oh_lo = (lo_iota == lo).astype(jnp.float32)            # [32, TP]
    # Outer-product histogram on the (otherwise idle) MXU:
    #   hist[h, l] = sum_t oh_hi[h, t] * oh_lo[l, t]
    hist_ref[...] = jax.lax.dot_general(
        oh_hi, oh_lo,
        dimension_numbers=(((1,), (1,)), ((), ())),
        preferred_element_type=jnp.float32)                # [32, 32]


def _per_pixel_stats(score3, target3, *, ignore_label, tile_p, use_bf16_exp):
    """score3: [N, C, HWp] logits; target3: [N, 1, HWp] int32. HWp % tile_p == 0."""
    N, C, HWp = score3.shape
    num_tiles = HWp // tile_p
    kernel = functools.partial(_ohem_ce_kernel, ignore_label=ignore_label,
                               use_bf16_exp=use_bf16_exp)
    return pl.pallas_call(
        kernel,
        out_shape=(
            jax.ShapeDtypeStruct((N, 2, HWp), jnp.float32),
            jax.ShapeDtypeStruct((N * num_tiles, _NBINS_HI, _NBINS_LO), jnp.float32),
        ),
        grid_spec=pltpu.PrefetchScalarGridSpec(
            num_scalar_prefetch=0,
            grid=(N, num_tiles),
            in_specs=[
                # classes on sublanes (full C), pixels on lanes (tile_p)
                pl.BlockSpec((None, C, tile_p), lambda n, i: (n, 0, i)),
                pl.BlockSpec((None, 1, tile_p), lambda n, i: (n, 0, i)),
            ],
            out_specs=(
                # fused lane-dense stats block [2, tile_p]
                pl.BlockSpec((None, 2, tile_p), lambda n, i: (n, 0, i)),
                # per-grid-step partial histogram [32, 32]
                pl.BlockSpec((None, _NBINS_HI, _NBINS_LO),
                             lambda n, i: (n * num_tiles + i, 0, 0)),
            ),
        ),
        compiler_params=pltpu.CompilerParams(
            dimension_semantics=("parallel", "parallel"),
            vmem_limit_bytes=64 * 1024 * 1024),
    )(score3, target3)


def _round_up(x, m):
    return -(-x // m) * m


def _choose_tile(hw, n_batch, max_tile=16384):
    """Lane tile (multiple of 128) + padded pixel count (multiple of the tile)."""
    assert max_tile % 128 == 0 and max_tile >= 128
    hw128 = _round_up(hw, 128)
    if n_batch < 2 and hw128 > 128:
        # keep >= 2 grid steps so both v7x TensorCores can get work
        max_tile = min(max_tile, max(128, _round_up(hw128 // 2, 128)))
    tile = min(max_tile, hw128)
    return tile, _round_up(hw128, tile)


def ohem_cross_entropy(score, target, *, ignore_label=255, thres=0.7,
                       min_kept=100000, max_tile=16384, use_bf16_exp=False):
    """Forward pass equivalent to OhemCrossEntropy (NUM_OUTPUTS=1, weights [1.0]).

    score : [N, C, H, W] float logits (NCHW, as in PyTorch); bf16 welcome (upcast in-kernel)
    target: [N, H, W]    integer labels
    returns scalar f32 loss
    """
    min_kept = max(1, int(min_kept))
    N, C, H, W = score.shape
    HW = H * W
    tile_p, hw_pad = _choose_tile(HW, N, max_tile=max_tile)

    # Free reshapes: keep NCHW order -> classes on sublanes, pixels on lanes.
    score3 = score.reshape(N, C, HW)
    target3 = target.reshape(N, 1, HW).astype(jnp.int32)
    if hw_pad != HW:
        score3 = jnp.pad(score3, ((0, 0), (0, 0), (0, hw_pad - HW)))
        target3 = jnp.pad(target3, ((0, 0), (0, 0), (0, hw_pad - HW)),
                          constant_values=ignore_label)

    stats, hist_blocks = _per_pixel_stats(
        score3, target3, ignore_label=ignore_label, tile_p=tile_p,
        use_bf16_exp=use_bf16_exp)
    loss = stats[:, 0, :].reshape(-1)          # 0 for ignored / padded pixels
    prob = stats[:, 1, :].reshape(-1)          # +inf for ignored / padded pixels

    # Global histogram of valid target-class probs (exact integer counts).
    hist = hist_blocks.astype(jnp.int32).sum(axis=0).reshape(-1)      # [1024]
    num_valid = jnp.sum(hist)
    cum = jnp.cumsum(hist)

    # k-th smallest prob (0-indexed) localized to one histogram bin.
    k = jnp.clip(jnp.minimum(jnp.int32(min_kept), num_valid - 1), 0, None)
    b_star = jnp.argmax(cum >= (k + 1))        # first bin with cum >= k+1 (0 if none)
    # Upper edge of the boundary bin: guarantees >= min_kept kept pixels, within
    # one 1/1024 bin of the exact k-th smallest prob.
    min_value = (b_star + 1).astype(jnp.float32) / jnp.float32(_NBINS)
    min_value = jnp.where(num_valid > 0, min_value, jnp.float32(min_kept))
    threshold = jnp.maximum(min_value, jnp.float32(thres))

    # Keep valid pixels whose target-class prob < threshold, then mean of losses.
    # prob=+inf for ignored/padded pixels => never kept.
    kept_f = (prob < threshold).astype(jnp.float32)
    return jnp.sum(loss * kept_f) / jnp.sum(kept_f)   # NaN on empty, like torch .mean()


def _reference(score, target, *, ignore_label=255, thres=0.7, min_kept=100000):
    """Pure-JAX reference (full sort) mirroring the PyTorch module, for sanity checks."""
    min_kept = max(1, int(min_kept))
    N, C, H, W = score.shape
    x = jnp.transpose(score, (0, 2, 3, 1)).reshape(-1, C).astype(jnp.float32)
    t = target.reshape(-1).astype(jnp.int32)
    logp = jax.nn.log_softmax(x, axis=-1)
    valid = t != ignore_label
    tc = jnp.where(t >= ignore_label, 0, t)
    tc = jnp.where(tc < 0, 0, tc)
    logp_t = jnp.take_along_axis(logp, tc[:, None], axis=-1)[:, 0]
    loss = jnp.where(valid, -logp_t, 0.0)
    prob = jnp.exp(logp_t)
    num_valid = jnp.sum(valid.astype(jnp.int32))
    pred_sorted = jnp.sort(jnp.where(valid, prob, jnp.inf))
    k = jnp.clip(jnp.minimum(jnp.int32(min_kept), num_valid - 1), 0, None)
    min_value = jnp.where(num_valid > 0, pred_sorted[k], jnp.float32(min_kept))
    threshold = jnp.maximum(min_value, jnp.float32(thres))
    kept = valid & (prob < threshold)
    return jnp.sum(loss * kept) / jnp.sum(kept.astype(jnp.float32))


if __name__ == "__main__":
    key = jax.random.PRNGKey(0)
    k1, k2, k3 = jax.random.split(key, 3)

    N, C, H, W = 2, 19, 16, 16
    IGNORE, THRES, MIN_KEPT = 255, 0.7, 50

    score = jax.random.normal(k1, (N, C, H, W), dtype=jnp.float32) * 2.0
    target = jax.random.randint(k2, (N, H, W), 0, C, dtype=jnp.int32)
    # sprinkle some ignored pixels
    ignore_mask = jax.random.uniform(k3, (N, H, W)) < 0.1
    target = jnp.where(ignore_mask, IGNORE, target)

    out = ohem_cross_entropy(score, target, ignore_label=IGNORE,
                             thres=THRES, min_kept=MIN_KEPT)
    out = jax.block_until_ready(out)

    ref = _reference(score, target, ignore_label=IGNORE,
                     thres=THRES, min_kept=MIN_KEPT)
    ref = jax.block_until_ready(ref)

    assert jnp.isfinite(out), f"non-finite loss: {out}"
    assert jnp.allclose(out, ref, rtol=1e-5, atol=1e-5), (out, ref)
    print("KERNEL_OK")
</pallas_src>

<mosaic_0001>
module attributes {stable_mosaic.version = 11 : i64} {
  func.func @_ohem_ce_kernel(%arg0: i32, %arg1: i32, %arg2: memref<1x19x256xf32, #tpu.memory_space<vmem>>, %arg3: memref<1x1x256xi32, #tpu.memory_space<vmem>>, %arg4: memref<1x2x256xf32, #tpu.memory_space<vmem>>, %arg5: memref<1x32x32xf32, #tpu.memory_space<vmem>>) attributes {dimension_semantics = [#tpu.dimension_semantics<parallel>, #tpu.dimension_semantics<parallel>], iteration_bounds = array<i64: 2, 1>, scalar_prefetch = 0 : i64, scratch_operands = 0 : i64, tpu.core_type = #tpu.core_type<tc>, window_params = [{transform_indices = @transform_0, window_bounds = array<i64: 1, 19, 256>}, {transform_indices = @transform_1, window_bounds = array<i64: 1, 1, 256>}, {transform_indices = @transform_2, window_bounds = array<i64: 1, 2, 256>}, {transform_indices = @transform_3, window_bounds = array<i64: 1, 32, 32>}]} {
    %c0 = arith.constant 0 : index
    %c0_0 = arith.constant 0 : index
    %c0_1 = arith.constant 0 : index
    %0 = vector.load %arg2[%c0, %c0_0, %c0_1] : memref<1x19x256xf32, #tpu.memory_space<vmem>>, vector<1x19x256xf32>
    %1 = vector.shape_cast %0 : vector<1x19x256xf32> to vector<19x256xf32>
    %c0_2 = arith.constant 0 : index
    %c0_3 = arith.constant 0 : index
    %c0_4 = arith.constant 0 : index
    %2 = vector.load %arg3[%c0_2, %c0_3, %c0_4] : memref<1x1x256xi32, #tpu.memory_space<vmem>>, vector<1x1x256xi32>
    %3 = vector.shape_cast %2 : vector<1x1x256xi32> to vector<1x256xi32>
    %cst = arith.constant dense<0xFF800000> : vector<256xf32>
    %4 = vector.multi_reduction <maximumf>, %1, %cst [0] : vector<19x256xf32> to vector<256xf32>
    %5 = vector.shape_cast %4 : vector<256xf32> to vector<1x256xf32>
    %6 = vector.broadcast %5 : vector<1x256xf32> to vector<19x256xf32>
    %7 = arith.subf %1, %6 : vector<19x256xf32>
    %8 = math.exp %7 : vector<19x256xf32>
    %cst_5 = arith.constant dense<0.000000e+00> : vector<256xf32>
    %9 = vector.multi_reduction <add>, %8, %cst_5 [0] : vector<19x256xf32> to vector<256xf32>
    %10 = vector.shape_cast %9 : vector<256xf32> to vector<1x256xf32>
    %11 = math.log %10 : vector<1x256xf32>
    %c255_i32 = arith.constant 255 : i32
    %12 = vector.broadcast %c255_i32 : i32 to vector<1x256xi32>
    %13 = arith.cmpi ne, %3, %12 : vector<1x256xi32>
    %c255_i32_6 = arith.constant 255 : i32
    %14 = vector.broadcast %c255_i32_6 : i32 to vector<1x256xi32>
    %15 = arith.cmpi sge, %3, %14 : vector<1x256xi32>
    %c0_i32 = arith.constant 0 : i32
    %16 = vector.broadcast %c0_i32 : i32 to vector<1x256xi32>
    %17 = arith.select %15, %16, %3 : vector<1x256xi1>, vector<1x256xi32>
    %c0_i32_7 = arith.constant 0 : i32
    %18 = vector.broadcast %c0_i32_7 : i32 to vector<1x256xi32>
    %19 = arith.cmpi slt, %17, %18 : vector<1x256xi32>
    %c0_i32_8 = arith.constant 0 : i32
    %20 = vector.broadcast %c0_i32_8 : i32 to vector<1x256xi32>
    %21 = arith.select %19, %20, %17 : vector<1x256xi1>, vector<1x256xi32>
    %22 = tpu.iota {dimensions = array<i32: 0>} : vector<19x1xi32>
    %23 = vector.broadcast %22 : vector<19x1xi32> to vector<19x256xi32>
    %24 = vector.broadcast %21 : vector<1x256xi32> to vector<19x256xi32>
    %25 = arith.cmpi eq, %23, %24 : vector<19x256xi32>
    %cst_9 = arith.constant 0.000000e+00 : f32
    %26 = vector.broadcast %cst_9 : f32 to vector<19x256xf32>
    %27 = arith.select %25, %7, %26 : vector<19x256xi1>, vector<19x256xf32>
    %cst_10 = arith.constant dense<0.000000e+00> : vector<256xf32>
    %28 = vector.multi_reduction <add>, %27, %cst_10 [0] : vector<19x256xf32> to vector<256xf32>
    %29 = vector.shape_cast %28 : vector<256xf32> to vector<1x256xf32>
    %30 = arith.subf %29, %11 : vector<1x256xf32>
    %cst_11 = arith.constant 0.000000e+00 : f32
    %31 = vector.broadcast %cst_11 : f32 to vector<1x256xf32>
    %32 = arith.subf %31, %30 : vector<1x256xf32>
    %cst_12 = arith.constant 0.000000e+00 : f32
    %33 = vector.broadcast %cst_12 : f32 to vector<1x256xf32>
    %34 = arith.select %13, %32, %33 : vector<1x256xi1>, vector<1x256xf32>
    %35 = math.exp %30 : vector<1x256xf32>
    %c0_13 = arith.constant 0 : index
    %c0_14 = arith.constant 0 : index
    %c0_15 = arith.constant 0 : index
    %36 = vector.load %arg4[%c0_13, %c0_14, %c0_15] : memref<1x2x256xf32, #tpu.memory_space<vmem>>, vector<1x1x256xf32>
    %37 = vector.shape_cast %36 : vector<1x1x256xf32> to vector<1x256xf32>
    %38 = vector.shape_cast %34 : vector<1x256xf32> to vector<1x1x256xf32>
    tpu.vector_store %arg4[%c0_13, %c0_14, %c0_15], %38 {strides = array<i32>} : memref<1x2x256xf32, #tpu.memory_space<vmem>>, vector<1x1x256xf32>,
    %cst_16 = arith.constant 0x7F800000 : f32
    %39 = vector.broadcast %cst_16 : f32 to vector<1x256xf32>
    %40 = arith.select %13, %35, %39 : vector<1x256xi1>, vector<1x256xf32>
    %c0_17 = arith.constant 0 : index
    %c1 = arith.constant 1 : index
    %c0_18 = arith.constant 0 : index
    %41 = vector.load %arg4[%c0_17, %c1, %c0_18] : memref<1x2x256xf32, #tpu.memory_space<vmem>>, vector<1x1x256xf32>
    %42 = vector.shape_cast %41 : vector<1x1x256xf32> to vector<1x256xf32>
    %43 = vector.shape_cast %40 : vector<1x256xf32> to vector<1x1x256xf32>
    tpu.vector_store %arg4[%c0_17, %c1, %c0_18], %43 {strides = array<i32>} : memref<1x2x256xf32, #tpu.memory_space<vmem>>, vector<1x1x256xf32>,
    %cst_19 = arith.constant 1.024000e+03 : f32
    %44 = vector.broadcast %cst_19 : f32 to vector<1x256xf32>
    %45 = arith.mulf %35, %44 : vector<1x256xf32>
    %46 = arith.fptosi %45 : vector<1x256xf32> to vector<1x256xi32>
    %c0_i32_20 = arith.constant 0 : i32
    %c1023_i32 = arith.constant 1023 : i32
    %47 = vector.broadcast %c0_i32_20 : i32 to vector<1x256xi32>
    %48 = arith.maxsi %47, %46 : vector<1x256xi32>
    %49 = vector.broadcast %c1023_i32 : i32 to vector<1x256xi32>
    %50 = arith.minsi %49, %48 : vector<1x256xi32>
    %c1024_i32 = arith.constant 1024 : i32
    %51 = vector.broadcast %c1024_i32 : i32 to vector<1x256xi32>
    %52 = arith.select %13, %50, %51 : vector<1x256xi1>, vector<1x256xi32>
    %c5_i32 = arith.constant 5 : i32
    %53 = vector.broadcast %c5_i32 : i32 to vector<1x256xi32>
    %54 = arith.shrsi %52, %53 : vector<1x256xi32>
    %c31_i32 = arith.constant 31 : i32
    %55 = vector.broadcast %c31_i32 : i32 to vector<1x256xi32>
    %56 = arith.andi %52, %55 : vector<1x256xi32>
    %57 = tpu.iota {dimensions = array<i32: 0>} : vector<32x1xi32>
    %58 = tpu.iota {dimensions = array<i32: 0>} : vector<32x1xi32>
    %59 = vector.broadcast %57 : vector<32x1xi32> to vector<32x256xi32>
    %60 = vector.broadcast %54 : vector<1x256xi32> to vector<32x256xi32>
    %61 = arith.cmpi eq, %59, %60 : vector<32x256xi32>
    %62 = arith.extui %61 : vector<32x256xi1> to vector<32x256xi32>
    %63 = arith.sitofp %62 : vector<32x256xi32> to vector<32x256xf32>
    %64 = vector.broadcast %58 : vector<32x1xi32> to vector<32x256xi32>
    %65 = vector.broadcast %56 : vector<1x256xi32> to vector<32x256xi32>
    %66 = arith.cmpi eq, %64, %65 : vector<32x256xi32>
    %67 = arith.extui %66 : vector<32x256xi1> to vector<32x256xi32>
    %68 = arith.sitofp %67 : vector<32x256xi32> to vector<32x256xf32>
    %cst_21 = arith.constant dense<0.000000e+00> : vector<32x32xf32>
    %69 = tpu.matmul %63, %68, %cst_21 {dimension_numbers = #tpu.dot_dimension_numbers<[1], [1], [0], [0], [0, 0, 1, 0], [], []>} : vector<32x256xf32>, vector<32x256xf32>, vector<32x32xf32> -> vector<32x32xf32>
    %c0_22 = arith.constant 0 : index
    %c0_23 = arith.constant 0 : index
    %c0_24 = arith.constant 0 : index
    %70 = vector.load %arg5[%c0_22, %c0_23, %c0_24] : memref<1x32x32xf32, #tpu.memory_space<vmem>>, vector<1x32x32xf32>
    %71 = vector.shape_cast %70 : vector<1x32x32xf32> to vector<32x32xf32>
    %72 = vector.shape_cast %69 : vector<32x32xf32> to vector<1x32x32xf32>
    tpu.vector_store %arg5[%c0_22, %c0_23, %c0_24], %72 {strides = array<i32>} : memref<1x32x32xf32, #tpu.memory_space<vmem>>, vector<1x32x32xf32>,
    return
  }
  func.func @transform_0(%arg0: i32, %arg1: i32) -> (i32, i32, i32) {
    %c0_i32 = arith.constant 0 : i32
    %c0_i32_0 = arith.constant 0 : i32
    return %arg0, %c0_i32, %arg1 : i32, i32, i32
  }
  func.func @transform_1(%arg0: i32, %arg1: i32) -> (i32, i32, i32) {
    %c0_i32 = arith.constant 0 : i32
    %c0_i32_0 = arith.constant 0 : i32
    return %arg0, %c0_i32, %arg1 : i32, i32, i32
  }
  func.func @transform_2(%arg0: i32, %arg1: i32) -> (i32, i32, i32) {
    %c0_i32 = arith.constant 0 : i32
    %c0_i32_0 = arith.constant 0 : i32
    return %arg0, %c0_i32, %arg1 : i32, i32, i32
  }
  func.func @transform_3(%arg0: i32, %arg1: i32) -> (i32, i32, i32) {
    %c1_i32 = arith.constant 1 : i32
    %0 = arith.muli %arg0, %c1_i32 : i32
    %1 = arith.addi %0, %arg1 : i32
    %c0_i32 = arith.constant 0 : i32
    %c0_i32_0 = arith.constant 0 : i32
    %c0_i32_1 = arith.constant 0 : i32
    return %1, %c0_i32, %c0_i32_0 : i32, i32, i32
  }
}

</mosaic_0001>

<bundles_post_ra>
// kernel: tpu_custom_call.1
= control target key start
LH: loop header
LB: loop body
LE: loop exit
PB: predicated region body
PF: predicated region fallthrough
CT: control target
= control target key end

     0   :  { %9 = vsyncpa [#allocation3], 0  ;;  %s1510_s0 = inlined_call_operand.hbm [shape: f32[2,19,256], index: 0, kind: input, shape index: {}]   ;;  %s1511_s1 = inlined_call_operand.hbm [shape: s32[2,1,256], index: 1, kind: input, shape index: {}]   ;;  %s1512_s2 = inlined_call_operand.hbm [shape: f32[2,2,256], index: 2, kind: output, shape index: {0}]   ;;  %s1513_s3 = inlined_call_operand.hbm [shape: f32[2,32,32], index: 3, kind: output, shape index: {1}]  }
   0x1   :  { %11 = vsyncpa [#allocation3 + $0x1], 0 }
   0x2   :  { %12 = vsyncpa [#allocation6], 0 }
   0x3   :  { %14 = vsyncpa [#allocation6 + $0x1], 0 }
   0x4   :  { %15 = vsyncpa [#allocation4], 0 }
   0x5   :  { %17 = vsyncpa [#allocation4 + $0x1], 0 }
   0x6   :  { %18 = vsyncpa [#allocation9], 0 }
   0x7   :  { %20 = vsyncpa [#allocation9 + $0x1], 0  ;;  %s1184_s12 = smov 0   ;;  %s1186_s13 = smov 0  }
   0x8   :  { %s1188_s14 = smov 0   ;;  %s1190_s15 = smov 0  }
   0x9   :  { %s1192_s16 = smov 0   ;;  %s1194_s17 = smov 0  }
   0xa LB: > { %s799_s18 = sadd.s32 4294967295, %s1151_s17   ;;  %s800_s19 = sadd.s32 4294967294, %s1151_s17   ;;  %s1151_s17 = sphi %s1194_s17, %s26_s17   ;;  %s1147_s16 = sphi %s1192_s16, %s1532_s16   ;;  %s1143_s15 = sphi %s1190_s15, %s1531_s15   ;;  %s1139_s14 = sphi %s1188_s14, %s1530_s14   ;;  %s1135_s13 = sphi %s1186_s13, %s1529_s13   ;;  %s1131_s12 = sphi %s1184_s12, %s1528_s12  }
   0xb   : > { %s38_s20 = sadd.s32 1, %s1147_s16  ;;  %s47_s21 = sadd.s32 1, %s1139_s14 }
   0xc   : > { %p40_p0 = scmp.ge.s32.totalorder %s38_s20, 2  ;;  %p54_p1 = scmp.ne.s32.totalorder %s1139_s14, %s1135_s13 }
   0xd   : > { %p55_p2 = scmp.eq.s32.totalorder %s1151_s17, 0  ;;  %p60_p3 = scmp.ne.s32.totalorder %s1135_s13, %s1131_s12 }
   0xe   : > { %s1534_s20 = smov (%p40_p0, %s38_s20), 0  ;;  %p61_p5 = scmp.eq.s32.totalorder %s799_s18, 0 }
   0xf   : > { %p1225_p4 = por %p55_p2, %p54_p1  ;;  %s42_s23 = ssub.s32 %s1147_s16, %s1534_s20 }
  0x10   : > { %p114_p6 = scmp.eq.s32.totalorder %s799_s18, 1  ;;  %p45_p7 = scmp.eq.s32.totalorder %s42_s23, 0 }
  0x11   : > { %p1231_p8 = por %p61_p5, %p60_p3  ;;  %p120_p10 = scmp.eq.s32.totalorder %s800_s19, 1 }
  0x12   : > { %p1235_p9 = por %p114_p6, %p54_p1  ;;  %p896_p13 = scmp.lt.s32.totalorder %s1151_s17, 2 }
  0x13   : > { %s1517_s24 = scalar_select %p1231_p8, 1, 0 }
  0x14   : > { %s1518_s25 = scalar_select %p1235_p9, 1, 0 }
  0x15   : > { %s1240_s26 = scalar_select %p45_p7, %s1139_s14, %s47_s21  }
  0x16   : > { %p1242_p11 = por %p120_p10, %p60_p3  ;;  %s1249_s28 = sand.u32 1, %s1139_s14  }
  0x17   : > { %s867_s29 = smul.u32 48, %s1249_s28  ;;  %p1255_p0 = pnand %p896_p13, %p1225_p4 }
  0x18   : > { %s1519_s27 = scalar_select %p1242_p11, 1, 0 }
  0x19   : > { %s868_s30 = smul.u32 768, %s1147_s16  ;;  %s172_s8 = scalar_lea.vmem [#allocation2], %s867_s29 }
  0x1a   : > { %s181_s9 = sshll.u32 %s172_s8, 4  ;;  %s169_s10 = scalar_lea.sflag [#allocation3], %s1249_s28  ;;  %s1264_s9 = int_to_ptr.vmem [resolvable:$true] %s181_s9 }
  0x1b   : > { %s1262_s7 = scalar_lea.hbm %s1510_s0, %s868_s30  ;;  %p975_p3 = pneg %p1255_p0 }
  0x1c   : > { %s973_s11 = scalar_lea.hbm %s1262_s7, 768  ;;  %s978_s21 = scalar_lea.hbm %s1510_s0, 1536 }
  0x1d   : > { %p974_p2 = scmp.ne.s32.totalorder %s1262_s7, %s973_s11  ;;  %p979_p6 = scmp.lt.u32.totalorder %s1262_s7, %s1510_s0 }
  0x1e   : > { %p980_p7 = scmp.lt.u32.totalorder %s978_s21, %s973_s11  ;;  %p982_p13 = scmp.lt.u32.totalorder %s973_s11, %s1262_s7 }
  0x1f   : > { %p976_p4 = pnand %p975_p3, %p974_p2 }
  0x20   : > { %p981_p10 = por %p980_p7, %p979_p6 }
  0x21   : > { %p977_p5 = pneg %p976_p4 }
  0x22   : > { %p983_p12 = por %p982_p13, %p981_p10 }
  0x24   : > { %p984_p1 = pnand %p983_p12, %p977_p5 }
  0x26   : > { %987 = shalt.err (!%p984_p1)
}
  0x27   : > { %s988_s29 = scalar_lea.vmem %s1264_s9, 768  ;;  %s1153_s30 = smov [#allocation2]  }
  0x28   : > { %p989_p2 = scmp.ne.s32.totalorder %s1264_s9, %s988_s29  ;;  %s993_s5 = sshll.u32 %s1153_s30, 4  ;;  %s994_s5 = int_to_ptr.vmem [resolvable:$false] %s993_s5 }
  0x29   : > { %s995_s6 = scalar_lea.vmem %s994_s5, 1536  ;;  %p996_p9 = scmp.lt.s32.totalorder %s1264_s9, %s994_s5 }
  0x2a   : > { %p991_p4 = pnand %p989_p2, %p975_p3  ;;  %p997_p6 = scmp.lt.s32.totalorder %s995_s6, %s988_s29 }
  0x2c   : > { %p992_p11 = pneg %p991_p4  ;;  %p998_p7 = por %p997_p6, %p996_p9 }
  0x2e   : > { %p999_p10 = pnand %p998_p7, %p992_p11 }
  0x30   : > { %1002 = shalt.err (!%p999_p10)
}
  0x31   : > { %s1154_s8 = smov 256   ;;  %s1155_s11 = smov 16  }
  0x32   : > { %885 = dma.hbm_to_vmem [thread:$0]  (!%p1255_p0), %s1262_s7, 768, %s1264_s9, %s169_s10, %s1154_s8, %s1154_s8, %s1155_s11  }
  0x33   : > { %p210_p12 = scmp.lt.s32.totalorder %s1151_s17, 3  ;;  %s804_s18 = sshll.u32 %s1249_s28, 1 }
  0x34   : > { %s852_s19 = sshll.u32 %s1147_s16, 5  ;;  %p1521_p9 = scmp.ge.s32.totalorder %s1151_s17, 1 }
  0x35   : > { %s1307_s29 = scalar_lea.hbm %s1511_s1, %s852_s19  ;;  %s195_s30 = scalar_lea.vmem [#allocation5], %s804_s18 }
  0x36   : > { %p1300_p11 = pnand %p1521_p9, %p210_p12  ;;  %s205_s5 = sshll.u32 %s195_s30, 4  ;;  %s206_s5 = int_to_ptr.vmem [resolvable:$true] %s205_s5 }
  0x37   : > { %s192_s7 = scalar_lea.sflag [#allocation6], %s1249_s28  ;;  %s1003_s9 = scalar_lea.hbm %s1307_s29, 32 }
  0x38   : > { %s1522_s21 = scalar_select %p1300_p11, 1, 0 }
  0x39   : > { %p1004_p1 = scmp.ne.s32.totalorder %s1307_s29, %s1003_s9  ;;  %s1008_s8 = scalar_lea.hbm %s1511_s1, 64 }
  0x3a   : > { %p1009_p2 = scmp.lt.u32.totalorder %s1307_s29, %s1511_s1  ;;  %p1010_p4 = scmp.lt.u32.totalorder %s1008_s8, %s1003_s9 }
  0x3b   : > { %p1006_p5 = pnand %p1004_p1, %p975_p3  ;;  %p1012_p7 = scmp.lt.u32.totalorder %s1003_s9, %s1307_s29 }
  0x3c   : > { %p1011_p6 = por %p1010_p4, %p1009_p2 }
  0x3d   : > { %p1007_p13 = pneg %p1006_p5 }
  0x3e   : > { %p1013_p10 = por %p1012_p7, %p1011_p6 }
  0x40   : > { %p1014_p12 = pnand %p1013_p10, %p1007_p13 }
  0x42   : > { %1017 = shalt.err (!%p1014_p12)
}
  0x43   : > { %s1018_s28 = scalar_lea.vmem %s206_s5, 32  ;;  %s1156_s18 = smov [#allocation5]  }
  0x44   : > { %p1019_p9 = scmp.ne.s32.totalorder %s206_s5, %s1018_s28  ;;  %s1023_s22 = sshll.u32 %s1156_s18, 4  ;;  %s1024_s22 = int_to_ptr.vmem [resolvable:$false] %s1023_s22 }
  0x45   : > { %s1025_s23 = scalar_lea.vmem %s1024_s22, 64  ;;  %p1026_p8 = scmp.lt.s32.totalorder %s206_s5, %s1024_s22 }
  0x46   : > { %p1021_p1 = pnand %p1019_p9, %p975_p3  ;;  %p1027_p11 = scmp.lt.s32.totalorder %s1025_s23, %s1018_s28 }
  0x48   : > { %p1022_p5 = pneg %p1021_p1  ;;  %p1028_p2 = por %p1027_p11, %p1026_p8 }
  0x4a   : > { %p1029_p4 = pnand %p1028_p2, %p1022_p5 }
  0x4c   : > { %1032 = shalt.err (!%p1029_p4)
}
  0x4d   : > { %888 = dma.hbm_to_vmem [thread:$0]  (!%p1255_p0), %s1307_s29, 32, %s206_s5, %s192_s7  }
  0x4e   : > { %p1523_p13 = scmp.ne.s32.totalorder %s1522_s21, 0 }
  0x4f   : > { %s1332_s30 = sand.u32 (!%p1523_p13), 1, %s1135_s13   ;;  %p1524_p3 = scmp.ne.s32.totalorder (!%p1523_p13), %s1517_s24, 0 }
  0x50   : > { %214 = sbr.rel (%p1523_p13) target bundleno = 443 (0x1bb), region = 28  ;;  %s217_s10 = scalar_lea.sflag (!%p1523_p13), [#allocation3], %s1332_s30 }
  0x51   : > { %s869_s9 = smul.u32 (!%p1523_p13), 48, %s1332_s30 }
  0x53   : > { %s220_s6 = scalar_lea.vmem (!%p1523_p13), [#allocation2], %s869_s9 }
  0x57   : > { %1114 = dma.done.wait (%p1524_p3), %s217_s10, 768  }
  0x58   : > { %1116 = vsyncadd (%p1524_p3), %s217_s10, 4294966528  ;;  %s808_s4 = sshll.u32 %s1332_s30, 1  ;;  %s226_s21 = scalar_lea.sflag [#allocation6], %s1332_s30 }
  0x59   : > { %s229_s29 = scalar_lea.vmem [#allocation5], %s808_s4 }
  0x5a   : > { %1118 = dma.done.wait (%p1524_p3), %s226_s21, 32  }
  0x5b   : > { %1120 = vsyncadd (%p1524_p3), %s226_s21, 4294967264  ;;  %vm273_vm0 = vcmask 1042432   ;;  %v266_v0 = vld [vmem:[%s220_s6] sm:$0xff]  ;;  %v267_v1 = vld [vmem:[%s220_s6 + $0x8] sm:$0xff]  ;;  %v337_v17 = vlaneseq  ;;  %s809_s24 = sshll.u32 %s1332_s30, 2  ;;  %s853_s5 = sshll.u32 %s1143_s15, 6 }
  0x5c   : > { %v270_v2 = vld [vmem:[%s220_s6 + $0x20] sm:$0x7]  ;;  %v271_v3 = vld [vmem:[%s220_s6 + $0x28] sm:$0x7]  ;;  %v268_v4 = vld [vmem:[%s220_s6 + $0x10] sm:$0xff]  ;;  %s254_s7 = scalar_lea.vmem [#allocation7], %s809_s24  ;;  %s1434_s28 = scalar_lea.hbm %s1512_s2, %s853_s5 }
  0x5d   : > { %v269_v5 = vld [vmem:[%s220_s6 + $0x18] sm:$0xff]  ;;  %v274_v6 = vsel %vm273_vm0, %v270_v2, -inf  ;;  %v283_v7 = vsel %vm273_vm0, %v271_v3, -inf  ;;  %v1348_v14 = vld [vmem:[%s229_s29] sm:$0x3]  ;;  %v1353_v23 = vshrl.u32 %v337_v17, 7 }
  0x5e   : > { %v275_v8 = vmax.f32 %v266_v0, %v274_v6  ;;  %v284_v9 = vmax.f32 %v267_v1, %v283_v7  ;;  %vm333_vm1 = vcmp.ge.s32.totalorder %v1348_v14, 255  ;;  %vm332_vm13 = vcmp.ne.s32.totalorder %v1348_v14, 255  ;;  %s639_s8 = sshll.u32 %s254_s7, 4  ;;  %s618_s18 = scalar_lea.sflag [#allocation4], %s1332_s30  ;;  %s640_s8 = int_to_ptr.vmem [resolvable:$true] %s639_s8 }
  0x5f   : > { %v334_v22 = vsel %vm333_vm1, 0, %v1348_v14  ;;  %v1356_v28 = vsub.s32 0, %v1353_v23  ;;  %v1359_v36 = vsub.s32 1, %v1353_v23  ;;  %v1362_v43 = vadd.s32 8, %v1353_v23  ;;  %s1033_s22 = scalar_lea.vmem %s640_s8, 64  ;;  %p1525_p0 = scmp.ne.s32.totalorder %s1518_s25, 0 }
  0x60   : > { %v276_v10 = vmax.f32 %v275_v8, %v268_v4  ;;  %v285_v11 = vmax.f32 %v284_v9, %v269_v5  ;;  %vm335_vm2 = vcmp.lt.s32.totalorder %v334_v22, 0  ;;  %v1366_v45 = vadd.s32 16, %v1353_v23  ;;  %p1034_p8 = scmp.ne.s32.totalorder %s640_s8, %s1033_s22  ;;  %s1160_s23 = smov [#allocation7]  }
  0x61   : > { %v336_v35 = vsel %vm335_vm2, 0, %v334_v22  ;;  %s1037_s9 = sshll.u32 %s1160_s23, 4  ;;  %s1038_s9 = int_to_ptr.vmem [resolvable:$false] %s1037_s9 }
  0x62   : > { %v277_v12 = vrot.slane %v276_v10, 4  ;;  %v286_v13 = vrot.slane %v285_v11, 4  ;;  %v344_v44 = vrot.slane %v336_v35, %v1356_v28  ;;  %v348_v46 = vrot.slane %v336_v35, %v1359_v36  ;;  %p1035_p11 = pnand %p1034_p8, %p1525_p0  ;;  %s1039_s10 = scalar_lea.vmem %s1038_s9, 128 }
  0x63   : > { %p1040_p7 = scmp.lt.s32.totalorder %s640_s8, %s1038_s9  ;;  %p1041_p10 = scmp.lt.s32.totalorder %s1039_s10, %s1033_s22 }
  0x64   : > { %v278_v15 = vmax.f32 %v276_v10, %v277_v12  ;;  %v287_v16 = vmax.f32 %v285_v11, %v286_v13  ;;  %vm349_vm3 = vcmp.eq.s32.totalorder %v1353_v23, %v344_v44  ;;  %vm351_vm4 = vcmp.eq.s32.totalorder %v1362_v43, %v344_v44  ;;  %p1036_p6 = pneg %p1035_p11 }
  0x65   : > { %vm350_vm5 = vcmp.eq.s32.totalorder %v1353_v23, %v348_v46  ;;  %vm352_vm6 = vcmp.eq.s32.totalorder %v1362_v43, %v348_v46  ;;  %vm353_vm7 = vcmp.eq.s32.totalorder %v1366_v45, %v344_v44  ;;  %vm354_vm8 = vcmp.eq.s32.totalorder %v1366_v45, %v348_v46  ;;  %p1042_p12 = por %p1041_p10, %p1040_p7 }
  0x66   : > { %v279_v18 = vrot.slane %v278_v15, 2  ;;  %v288_v19 = vrot.slane %v287_v16, 2 }
  0x67   : > { %p1043_p9 = pnand %p1042_p12, %p1036_p6 }
  0x68   : > { %v280_v20 = vmax.f32 %v278_v15, %v279_v18  ;;  %v289_v21 = vmax.f32 %v287_v16, %v288_v19 }
  0x6a   : > { %v281_v24 = vrot.slane %v280_v20, 1  ;;  %v290_v25 = vrot.slane %v289_v21, 1 }
  0x6c   : > { %v282_v26 = vmax.f32 %v280_v20, %v281_v24  ;;  %v291_v27 = vmax.f32 %v289_v21, %v290_v25 }
  0x6e   : > { %v292_v29 = vsub.f32 %v266_v0, %v282_v26  ;;  %v293_v30 = vsub.f32 %v267_v1, %v291_v27  ;;  %v294_v31 = vsub.f32 %v268_v4, %v282_v26  ;;  %v295_v32 = vsub.f32 %v269_v5, %v291_v27 }
  0x6f   : > { %v296_v33 = vsub.f32 %v270_v2, %v282_v26  ;;  %v297_v34 = vsub.f32 %v271_v3, %v291_v27 }
  0x70   : > { %v298_v37 = vmul.f32 1.442695, %v292_v29  ;;  %v300_v38 = vmul.f32 1.442695, %v293_v30  ;;  %v302_v39 = vmul.f32 1.442695, %v294_v31 }
  0x71   : > { %v304_v40 = vmul.f32 1.442695, %v295_v32  ;;  %v306_v41 = vmul.f32 1.442695, %v296_v33  ;;  %v308_v42 = vmul.f32 1.442695, %v297_v34 }
  0x72   : > { %953 = vpow2.f32 %v298_v37  ;;  %v355_v47 = vsel %vm349_vm3, %v292_v29, 0.0  ;;  %v357_v48 = vsel %vm351_vm4, %v294_v31, 0.0  ;;  %v356_v49 = vsel %vm350_vm5, %v293_v30, 0.0 }
  0x73   : > { %955 = vpow2.f32 %v300_v38  ;;  %v358_v50 = vsel %vm352_vm6, %v295_v32, 0.0  ;;  %v359_v51 = vsel %vm353_vm7, %v296_v33, 0.0  ;;  %v360_v53 = vsel %vm354_vm8, %v297_v34, 0.0 }
  0x74   : > { %957 = vpow2.f32 %v302_v39  ;;  %v361_v55 = vadd.f32 %v357_v48, %v355_v47  ;;  %v362_v57 = vsel %vm273_vm0, %v359_v51, 0.0  ;;  %v370_v58 = vadd.f32 %v358_v50, %v356_v49 }
  0x75   : > { %959 = vpow2.f32 %v304_v40  ;;  %v371_v61 = vsel %vm273_vm0, %v360_v53, 0.0  ;;  %v1157_v49 = vmov 1966171168  }
  0x76   : > { %961 = vpow2.f32 %v306_v41  ;;  %v363_v2 = vadd.f32 %v362_v57, %v361_v55  ;;  %v372_v5 = vadd.f32 %v371_v61, %v370_v58  ;;  %v387_v50 = vunpack.c.l.s4 %v1157_v49 }
  0x77   : > { %963 = vpow2.f32 %v308_v42 }
  0x78   : > { %v364_v9 = vrot.slane %v363_v2, 4  ;;  %v373_v11 = vrot.slane %v372_v5, 4  ;;  %v388_v55 = vunpack.c.0.s8 %v387_v50 }
  0x7a   : > { %v365_v16 = vadd.f32 %v364_v9, %v363_v2  ;;  %v374_v19 = vadd.f32 %v373_v11, %v372_v5 }
  0x7c   : > { %v954_v52 = vpop.eup %953  ;;  %v366_v24 = vrot.slane %v365_v16, 2  ;;  %v375_v26 = vrot.slane %v374_v19, 2 }
  0x7d   : > { %v956_v54 = vpop.eup %955 }
  0x7e   : > { %v958_v56 = vpop.eup %957  ;;  %v367_v29 = vadd.f32 %v366_v24, %v365_v16  ;;  %v376_v30 = vadd.f32 %v375_v26, %v374_v19 }
  0x7f   : > { %v960_v59 = vpop.eup %959  ;;  %v310_v60 = vadd.f32 %v958_v56, %v954_v52 }
  0x80   : > { %v962_v62 = vpop.eup %961  ;;  %v319_v63 = vadd.f32 %v960_v59, %v956_v54  ;;  %v368_v31 = vrot.slane %v367_v29, 1  ;;  %v377_v32 = vrot.slane %v376_v30, 1  ;;  %v1392_v59 = vsub.s32 %v388_v55, %v1353_v23 }
  0x81   : > { %v964_v0 = vpop.eup %963  ;;  %v311_v1 = vsel %vm273_vm0, %v962_v62, 0.0 }
  0x82   : > { %v312_v3 = vadd.f32 %v311_v1, %v310_v60  ;;  %v320_v4 = vsel %vm273_vm0, %v964_v0, 0.0  ;;  %v369_v33 = vadd.f32 %v368_v31, %v367_v29  ;;  %v378_v35 = vadd.f32 %v377_v32, %v376_v30 }
  0x83   : > { %v321_v6 = vadd.f32 %v320_v4, %v319_v63  ;;  %v462_v4 = vadd.s32 24, %v1353_v23 }
  0x84   : > { %v313_v7 = vrot.slane %v312_v3, 4 }
  0x85   : > { %v322_v8 = vrot.slane %v321_v6, 4 }
  0x86   : > { %v314_v10 = vadd.f32 %v313_v7, %v312_v3 }
  0x87   : > { %v323_v12 = vadd.f32 %v322_v8, %v321_v6  ;;  %v1158_v8 = vmov 1.0|1.0  }
  0x88   : > { %v315_v13 = vrot.slane %v314_v10, 2 }
  0x89   : > { %v324_v15 = vrot.slane %v323_v12, 2 }
  0x8a   : > { %v316_v18 = vadd.f32 %v315_v13, %v314_v10 }
  0x8b   : > { %v325_v20 = vadd.f32 %v324_v15, %v323_v12 }
  0x8c   : > { %v317_v21 = vrot.slane %v316_v18, 1 }
  0x8d   : > { %v326_v22 = vrot.slane %v325_v20, 1 }
  0x8e   : > { %v318_v25 = vadd.f32 %v317_v21, %v316_v18 }
  0x8f   : > { %v327_v27 = vadd.f32 %v326_v22, %v325_v20 }
  0x90   : > { %965 = vlog2.f32 %v318_v25 }
  0x91   : > { %967 = vlog2.f32 %v327_v27 }
  0x9a   : > { %v966_v34 = vpop.eup %965 }
  0x9b   : > { %v968_v37 = vpop.eup %967  ;;  %v329_v38 = vmul.f32 0.6931472, %v966_v34 }
  0x9c   : > { %v331_v39 = vmul.f32 0.6931472, %v968_v37 }
  0x9d   : > { %v1379_v40 = vsub.f32 %v369_v33, %v329_v38 }
  0x9e   : > { %v1381_v41 = vsub.f32 %v378_v35, %v331_v39 }
  0x9f   : > { %v402_v42 = vmul.f32 1.442695, %v1379_v40 }
  0xa0   : > { %v404_v44 = vmul.f32 1.442695, %v1381_v41 }
  0xa1   : > { %969 = vpow2.f32 %v402_v42 }
  0xa2   : > { %971 = vpow2.f32 %v404_v44 }
  0xab   : > { %v1385_v46 = vpop.eup %969 }
  0xac   : > { %v1387_v47 = vpop.eup %971  ;;  %v432_v48 = vmul.f32 1024.0, %v1385_v46 }
  0xad   : > { %v433_v51 = vmul.f32 1024.0, %v1387_v47 }
  0xae   : > { %v870_v52 = vtrunc.f32 %v432_v48 }
  0xaf   : > { %v872_v53 = vtrunc.f32 %v433_v51 }
  0xb0   : > { %v871_v54 = vcvt.f32.s32 %v870_v52 }
  0xb1   : > { %v873_v56 = vcvt.f32.s32 %v872_v53 }
  0xb2   : > { %vm436_vm9 = vcmp.gt.s32.totalorder %v871_v54, 0 }
  0xb3   : > { %v437_v57 = vsel %vm436_vm9, %v871_v54, 0  ;;  %vm438_vm10 = vcmp.gt.s32.totalorder %v873_v56, 0 }
  0xb4   : > { %v439_v58 = vsel %vm438_vm10, %v873_v56, 0  ;;  %vm440_vm11 = vcmp.lt.s32.totalorder %v437_v57, 1023 }
  0xb5   : > { %v441_v60 = vsel %vm440_vm11, %v437_v57, 1023  ;;  %vm442_vm12 = vcmp.lt.s32.totalorder %v439_v58, 1023 }
  0xb6   : > { %v443_v61 = vsel %vm442_vm12, %v439_v58, 1023 }
  0xb7   : > { %v444_v62 = vcombine.low %v441_v60, %v443_v61 }
  0xb9   : > { %v451_v63 = vrot.slane %v444_v62, %v1392_v59 }
  0xbb   : > { %v458_v0 = vrot.slane %v451_v63, %v1392_v59 }
  0xbd   : > { %v459_v1 = vsel %vm332_vm13, %v458_v0, 1024 }
  0xbe   : > { %v461_v2 = vand.u32 31, %v459_v1  ;;  %v460_v3 = vshra.s32 %v459_v1, 5 }
  0xc0   : > { %v502_v5 = vrot.slane %v461_v2, %v1359_v36  ;;  %v498_v6 = vrot.slane %v461_v2, %v1356_v28  ;;  %v470_v7 = vrot.slane %v460_v3, %v1359_v36  ;;  %v1159_v36 = vmov 1.0  }
  0xc1   : > { %v466_v9 = vrot.slane %v460_v3, %v1356_v28  ;;  %v381_v28 = vsub.f32 0.0, %v1379_v40 }
  0xc2   : > { %vm504_vm14 = vcmp.eq.s32.totalorder %v1353_v23, %v502_v5  ;;  %vm506_vm15 = vcmp.eq.s32.totalorder %v1362_v43, %v502_v5  ;;  %vm503_vm0 = vcmp.eq.s32.totalorder %v1353_v23, %v498_v6  ;;  %vm505_vm1 = vcmp.eq.s32.totalorder %v1362_v43, %v498_v6 }
  0xc3   : > { %vm855_vm2 = vmpackc.low %vm506_vm15, %vm504_vm14  ;;  %vm508_vm3 = vcmp.eq.s32.totalorder %v1366_v45, %v502_v5  ;;  %vm510_vm4 = vcmp.eq.s32.totalorder %v462_v4, %v502_v5  ;;  %vm472_vm6 = vcmp.eq.s32.totalorder %v1353_v23, %v470_v7  ;;  %vm476_vm7 = vcmp.eq.s32.totalorder %v1366_v45, %v470_v7 }
  0xc4   : > { %856 = vmatprep.subr.msk.bf16.mxu0 %vm855_vm2, %v1158_v8  ;;  %863 = vmatprep.subr.msk.bf16.mxu1 %vm855_vm2, %v1158_v8  ;;  %vm857_vm5 = vmpackc.low %vm505_vm1, %vm503_vm0  ;;  %vm507_vm9 = vcmp.eq.s32.totalorder %v1366_v45, %v498_v6  ;;  %vm509_vm10 = vcmp.eq.s32.totalorder %v462_v4, %v498_v6  ;;  %vm471_vm12 = vcmp.eq.s32.totalorder %v1353_v23, %v466_v9  ;;  %v382_v23 = vsub.f32 0.0, %v1381_v41 }
  0xc5   : > { %858 = vmatpush1.bf16.xpose.msk.msra.mxu0 %vm857_vm5, %v1158_v8  ;;  %865 = vmatpush1.bf16.xpose.msk.msra.mxu1 %vm857_vm5, %v1158_v8  ;;  %vm859_vm8 = vmpackc.low %vm510_vm4, %vm508_vm3  ;;  %vm475_vm14 = vcmp.eq.s32.totalorder %v1366_v45, %v466_v9  ;;  %vm474_vm15 = vcmp.eq.s32.totalorder %v1362_v43, %v470_v7  ;;  %vm478_vm0 = vcmp.eq.s32.totalorder %v462_v4, %v470_v7  ;;  %vm408_vm3 = vcmp.lt.s32.totalorder %v337_v17, 256 }
  0xc6   : > { %860 = vmatprep.subr.msk.bf16.mxu0 %vm859_vm8, %v1158_v8  ;;  %864 = vmatprep.subr.msk.bf16.mxu1 %vm859_vm8, %v1158_v8  ;;  %vm861_vm11 = vmpackc.low %vm509_vm10, %vm507_vm9  ;;  %vm473_vm1 = vcmp.eq.s32.totalorder %v1362_v43, %v466_v9  ;;  %vm477_vm2 = vcmp.eq.s32.totalorder %v462_v4, %v466_v9  ;;  %v385_v10 = vcombine.low %v381_v28, %v382_v23 }
  0xc7   : > { %836 = vmatprep.mubr.msk.f32.mxu0 %vm472_vm6, %v1159_v36  ;;  %840 = vmatprep.mubr.msk.f32.mxu1 %vm476_vm7, %v1159_v36  ;;  %v413_v45 = vcombine.low %v1385_v46, %v1387_v47 }
  0xc8   : > { %v392_v11 = vrot.slane %v385_v10, %v1392_v59 }
  0xc9   : > { %v420_v12 = vrot.slane %v413_v45, %v1392_v59 }
  0xca   : > { %v399_v43 = vrot.slane %v392_v11, %v1392_v59 }
  0xcb   : > { %v427_v13 = vrot.slane %v420_v12, %v1392_v59 }
  0xcc   : > { %v401_v15 = vsel %vm332_vm13, %v399_v43, 0.0 }
  0xcd   : > { %862 = vmatpush1.bf16.xpose.msk.msra.mxu0 %vm861_vm11, %v1158_v8  ;;  %866 = vmatpush1.bf16.xpose.msk.msra.mxu1 %vm861_vm11, %v1158_v8  ;;  %v429_v16 = vsel %vm332_vm13, %v427_v13, inf  ;;  %410 = vst.msk [vmem:[%s254_s7] ss:$2 sm:$0x3] %vm408_vm3, %v401_v15 }
  0xce   : > { %811 = vst.msk [vmem:[%s254_s7 + $0x1] ss:$2 sm:$0x3] %vm408_vm3, %v429_v16 }
  0xd4   : > { %837 = vmatmul.mubr.msk.f32.vlgmr.msra.gmra.mrb[0].mxu0 %vm471_vm12, %v1159_v36  ;;  %841 = vmatmul.mubr.msk.f32.vlgmr.msra.gmra.mrb[0].mxu1 %vm475_vm14, %v1159_v36 }
  0xd5   : > { %838 = vmatprep.mubr.msk.f32.mxu0 %vm474_vm15, %v1159_v36  ;;  %842 = vmatprep.mubr.msk.f32.mxu1 %vm478_vm0, %v1159_v36 }
  0xd8   : > { %839 = vmatmul.mubr.msk.f32.gmra.mrb[2].mxu0 %vm473_vm1, %v1159_v36  ;;  %843 = vmatmul.mubr.msk.f32.gmra.mrb[2].mxu1 %vm477_vm2, %v1159_v36 }
  0xd9   : > { %1046 = shalt.err (!%p1043_p9)
}
  0xda   : > { %s1047_s6 = scalar_lea.hbm %s1434_s28, 64  ;;  %s1051_s29 = scalar_lea.hbm %s1512_s2, 128 }
  0xdb   : > { %p1048_p1 = scmp.ne.s32.totalorder %s1434_s28, %s1047_s6  ;;  %p1052_p4 = scmp.lt.u32.totalorder %s1434_s28, %s1512_s2 }
  0xdc   : > { %p1053_p13 = scmp.lt.u32.totalorder %s1051_s29, %s1047_s6  ;;  %p1055_p8 = scmp.lt.u32.totalorder %s1047_s6, %s1434_s28 }
  0xdd   : > { %p1049_p5 = pnand %p1048_p1, %p1525_p0 }
  0xde   : > { %p1054_p3 = por %p1053_p13, %p1052_p4 }
  0xdf   : > { %p1050_p2 = pneg %p1049_p5 }
  0xe0   : > { %p1056_p11 = por %p1055_p8, %p1054_p3 }
  0xe2   : > { %p1057_p6 = pnand %p1056_p11, %p1050_p2 }
  0xe4   : > { %1060 = shalt.err (!%p1057_p6)
}
  0xe5   : > { %878 = dma.vmem_to_hbm [thread:$0]  (%p1525_p0), %s640_s8, 64, %s1434_s28, %s618_s18   ;;  %vm612_vm13 = vcmask 261120  }
  0xe6   : > { %s810_s7 = sshll.u32 %s1332_s30, 5  ;;  %s854_s22 = sshll.u32 %s1143_s15, 9 }
  0xe7   : > { %s261_s11 = scalar_lea.vmem [#allocation8], %s810_s7  ;;  %s1461_s8 = scalar_lea.hbm %s1513_s3, %s854_s22 }
  0xe8   : > { %s653_s19 = sshll.u32 %s261_s11, 4  ;;  %s623_s15 = scalar_lea.sflag [#allocation9], %s1332_s30  ;;  %s1456_s19 = int_to_ptr.vmem [resolvable:$true] %s653_s19 }
  0xe9   : > { %s1061_s28 = scalar_lea.vmem %s1456_s19, 512  ;;  %s1161_s18 = smov [#allocation8]  }
  0xea   : > { %p1062_p7 = scmp.ne.s32.totalorder %s1456_s19, %s1061_s28  ;;  %s1065_s10 = sshll.u32 %s1161_s18, 4  ;;  %s1066_s10 = int_to_ptr.vmem [resolvable:$false] %s1065_s10 }
  0xeb   : > { %s1067_s6 = scalar_lea.vmem %s1066_s10, 1024  ;;  %p1068_p9 = scmp.lt.s32.totalorder %s1456_s19, %s1066_s10 }
  0xec   : > { %p1063_p10 = pnand %p1062_p7, %p1525_p0  ;;  %p1069_p1 = scmp.lt.s32.totalorder %s1067_s6, %s1061_s28 }
  0xee   : > { %p1064_p12 = pneg %p1063_p10  ;;  %p1070_p5 = por %p1069_p1, %p1068_p9 }
  0xf0   : > { %p1071_p2 = pnand %p1070_p5, %p1064_p12 }
 0x1a7   : > { %v593_v14 = vpop.f32.mrb[0].mxu0  ;;  %v603_v17 = vpop.f32.mrb[0].mxu1 }
 0x1a8   : > { %613 = vst.msk [vmem:[%s261_s11] sm:$0xff] %vm612_vm13, %v593_v14  ;;  %615 = vst.msk [vmem:[%s261_s11 + $0x10] sm:$0xff] %vm612_vm13, %v603_v17  ;;  %v595_v18 = vpop.f32.mrb[1].mxu0  ;;  %v605_v19 = vpop.f32.mrb[1].mxu1 }
 0x1ab   : > { %v598_v20 = vpop.f32.mrb[2].mxu0  ;;  %v608_v21 = vpop.f32.mrb[2].mxu1 }
 0x1ac   : > { %614 = vst.msk [vmem:[%s261_s11 + $0x8] sm:$0xff] %vm612_vm13, %v598_v20  ;;  %616 = vst.msk [vmem:[%s261_s11 + $0x18] sm:$0xff] %vm612_vm13, %v608_v21  ;;  %v600_v22 = vpop.f32.mrb[3].mxu0  ;;  %v610_v24 = vpop.f32.mrb[3].mxu1 }
 0x1ad   : > { %1074 = shalt.err (!%p1071_p2)
}
 0x1ae   : > { %s1075_s4 = scalar_lea.hbm %s1461_s8, 512  ;;  %s1079_s24 = scalar_lea.hbm %s1513_s3, 1024 }
 0x1af   : > { %p1076_p4 = scmp.ne.s32.totalorder %s1461_s8, %s1075_s4  ;;  %p1080_p8 = scmp.lt.u32.totalorder %s1461_s8, %s1513_s3 }
 0x1b0   : > { %p1081_p11 = scmp.lt.u32.totalorder %s1079_s24, %s1075_s4  ;;  %p1083_p7 = scmp.lt.u32.totalorder %s1075_s4, %s1461_s8 }
 0x1b1   : > { %p1077_p13 = pnand %p1076_p4, %p1525_p0 }
 0x1b2   : > { %p1082_p6 = por %p1081_p11, %p1080_p8 }
 0x1b3   : > { %p1078_p3 = pneg %p1077_p13 }
 0x1b4   : > { %p1084_p10 = por %p1083_p7, %p1082_p6 }
 0x1b6   : > { %p1085_p12 = pnand %p1084_p10, %p1078_p3 }
 0x1b8   : > { %1088 = shalt.err (!%p1085_p12)
}
 0x1b9   : > { %s1162_s11 = smov 128   ;;  %s1163_s22 = smov 8  }
 0x1ba   : > { %879 = dma.vmem_to_hbm [thread:$0]  (%p1525_p0), %s1456_s19, 512, %s1461_s8, %s623_s15, %s1162_s11, %s1162_s11, %s1163_s22  }
 0x1bb PF: > { %s668_s23 = sand.u32 1, %s1131_s12   ;;  %p1526_p9 = scmp.ne.s32.totalorder %s1519_s27, 0 }
 0x1bc   : > { %p1527_p1 = scmp.ge.s32.totalorder %s1151_s17, 2  ;;  %s669_s9 = scalar_lea.sflag [#allocation4], %s668_s23 }
 0x1be   : > { %p890_p5 = pnand %p1527_p1, %p1526_p9 }
 0x1c0   : > { %1122 = dma.done.wait (!%p890_p5), %s669_s9, 64  }
 0x1c1   : > { %1124 = vsyncadd (!%p890_p5), %s669_s9, 4294967232  ;;  %s678_s28 = scalar_lea.sflag [#allocation9], %s668_s23 }
 0x1c2   : > { %1126 = dma.done.wait (!%p890_p5), %s678_s28, 512  }
 0x1c3   : > { %1128 = vsyncadd (!%p890_p5), %s678_s28, 4294966784  ;;  %s26_s17 = sadd.s32 1, %s1151_s17   ;;  %s1528_s12 = smov %s1135_s13 }
 0x1c4   : > { %p23_p2 = scmp.ge.s32.totalorder %s26_s17, 4   ;;  %s1529_s13 = smov %s1139_s14 }
 0x1c5   : > { %s1530_s14 = smov %s1240_s26  ;;  %s1531_s15 = smov %s1147_s16 }
 0x1c6   : > { %s1532_s16 = smov %s1534_s20  ;;  %25 = sbr.rel (!%p23_p2) target bundleno = 10 (0xa), region = 104 }
 0x1cd   :  { %683 = vsyncpa [#allocation3], 1 }
 0x1ce   :  { %685 = vsyncpa [#allocation3 + $0x1], 1 }
 0x1cf   :  { %686 = vsyncpa [#allocation6], 1 }
 0x1d0   :  { %688 = vsyncpa [#allocation6 + $0x1], 1 }
 0x1d1   :  { %689 = vsyncpa [#allocation4], 1 }
 0x1d2   :  { %691 = vsyncpa [#allocation4 + $0x1], 1 }
 0x1d3   :  { %692 = vsyncpa [#allocation9], 1 }
 0x1d4   :  { %694 = vsyncpa [#allocation9 + $0x1], 1 }

</bundles_post_ra>
